<compile_context>
chip_gen: v5e
topology: v5e:2x2
jax: 0.10.0
libtpu: 0.0.40
codegen_flags: <defaults>
</compile_context>

<pallas_src>
import math

import jax
import jax.numpy as jnp
from jax import lax
from jax.experimental import pallas as pl
from jax.experimental.pallas import tpu as pltpu


_MAX_UNROLL_PLANES = 16                  # static unroll bound for in-block reversal
_DEFAULT_MIN_PALLAS_BYTES = 64 * 1024    # below this, let XLA fuse the flip


def _flip_planes_kernel(x_ref, o_ref):
    """Copy an (r, S, L) block while reversing its leading (plane) axis.

    The block-order part of the flip is handled by the output BlockSpec
    index_map; this kernel only reverses planes *within* one block.  Each
    plane move is a full (S, L) load + store on the two minor (tiled) dims,
    so there is no sublane masking regardless of r.
    """
    r = x_ref.shape[0]
    if r == 1:
        o_ref[...] = x_ref[...]
    elif r <= _MAX_UNROLL_PLANES:
        for i in range(r):                       # small static unroll
            o_ref[pl.ds(r - 1 - i, 1)] = x_ref[pl.ds(i, 1)]
    else:
        half = r // 2

        def body(i, carry):                      # symmetric swap: 2 planes / iter
            j = r - 1 - i
            o_ref[pl.ds(j, 1)] = x_ref[pl.ds(i, 1)]
            o_ref[pl.ds(i, 1)] = x_ref[pl.ds(j, 1)]
            return carry

        lax.fori_loop(0, half, body, 0)
        if r % 2 == 1:                           # middle plane (static index)
            o_ref[pl.ds(half, 1)] = x_ref[pl.ds(half, 1)]


def _generation_defaults():
    """(target_block_bytes, vmem_limit_bytes), gated on the TPU generation."""
    vmem_cap = 0
    try:
        vmem_cap = int(getattr(pltpu.get_tpu_info(), "vmem_capacity_bytes", 0))
    except Exception:
        vmem_cap = 0
    if vmem_cap >= (96 << 20):
        # v5e / v6e: 128 MiB physical VMEM -> larger tiles, fewer grid steps.
        return 8 << 20, 64 << 20
    # v7x (64 MiB physical / 32 MiB scoped) or unknown: keep the 2-in + 2-out
    # double-buffered working set well under half the scoped budget.
    return 4 << 20, 32 << 20


def _largest_divisor_at_most(n: int, cap: int) -> int:
    """Largest divisor of n that is <= cap (always >= 1)."""
    cap = max(1, min(cap, n))
    best, d = 1, 1
    while d * d <= n:
        if n % d == 0:
            if d <= cap:
                best = max(best, d)
            q = n // d
            if q <= cap:
                best = max(best, q)
        d += 1
    return best


def _factor_plane(p: int, max_lanes: int):
    """Factor the per-index payload length p into (S, L) maximizing (8,128)
    tile fullness; L is capped so an (8, L) slab stays within the byte budget."""
    if p <= 1:
        return 1, max(p, 1)
    best_s, best_l, best_score = p, 1, -1.0
    d = 1
    while d * d <= p:
        if p % d == 0:
            for l in (d, p // d):
                if l > max_lanes:
                    continue
                s = p // l
                lane_u = l / (128.0 * ((l + 127) // 128))
                sub_u = s / (8.0 * ((s + 7) // 8))
                score = lane_u * sub_u
                if score > best_score + 1e-12 or (
                        abs(score - best_score) <= 1e-12 and l > best_l):
                    best_s, best_l, best_score = s, l, score
        d += 1
    return best_s, best_l


def _choose_blocks(r_total, s_total, l_total, itemsize, target):
    plane_bytes = s_total * l_total * itemsize
    if plane_bytes <= target:
        # Whole planes per block; cap r_blk at R//2 so the parallel R axis has
        # >= 2 blocks (keeps both TensorCores busy on v7x megacore).
        budget = max(1, target // plane_bytes)
        if r_total >= 2:
            budget = min(budget, r_total // 2)
        r_blk = _largest_divisor_at_most(r_total, budget)
        s_blk = s_total
    else:
        # A single plane exceeds the byte target: keep one plane per block and
        # split its sublane axis instead (cdiv tail handled by Pallas padding).
        r_blk = 1
        rows = max(8, (target // max(1, l_total * itemsize)) // 8 * 8)
        s_blk = s_total if rows >= s_total else rows
    return r_blk, s_blk


def flip_pallas(x: jax.Array, dims=(0, 1), *, target_block_bytes=None,
                vmem_limit_bytes=None,
                min_pallas_bytes: int = _DEFAULT_MIN_PALLAS_BYTES) -> jax.Array:
    """torch.flip(x, dims), with the reversal done by a Pallas streaming-copy
    kernel whenever that is profitable; small / awkward cases defer to XLA."""
    nd = x.ndim
    norm = []
    for d in dims:
        d = int(d)
        if d < 0:
            d += nd
        if not 0 <= d < nd:
            raise ValueError(f"flip dim {d} out of range for ndim={nd}")
        norm.append(d)
    dims = tuple(sorted(set(norm)))
    if not dims:
        return x

    shape = x.shape
    itemsize = jnp.dtype(x.dtype).itemsize
    nbytes = x.size * itemsize

    lo, hi = dims[0], dims[-1]
    contiguous = dims == tuple(range(lo, hi + 1))
    r_total = math.prod(shape[lo:hi + 1]) if contiguous else 0
    p_total = math.prod(shape[hi + 1:]) if hi + 1 < nd else 1

    if contiguous and r_total <= 1:
        return x                                  # reversing a length-1 index: no-op

    # XLA fallback: tiny tensors (pallas_call fixed overhead dominates),
    # non-contiguous dim sets, or flips that reach into the minor axis.
    # TODO(synk): tensors with tiny trailing planes (< one (8,128) tile) but a
    # huge flip extent would need a dedicated sublane-reversal kernel.
    if (not contiguous) or p_total <= 1 or nbytes < min_pallas_bytes:
        return jnp.flip(x, axis=dims)

    b_total = math.prod(shape[:lo]) if lo > 0 else 1

    target, vmem_limit = _generation_defaults()
    if target_block_bytes is not None:
        target = int(target_block_bytes)
    if vmem_limit_bytes is not None:
        vmem_limit = int(vmem_limit_bytes)

    max_lanes = max(128, target // (8 * itemsize))
    s_total, l_total = _factor_plane(p_total, max_lanes)
    r_blk, s_blk = _choose_blocks(r_total, s_total, l_total, itemsize, target)
    nr = r_total // r_blk
    ns = -(-s_total // s_blk)

    block_bytes = r_blk * s_blk * l_total * itemsize
    vmem_limit = max(vmem_limit, 4 * block_bytes + (2 << 20))

    if b_total == 1:
        view = (r_total, s_total, l_total)
        if ns == 1:
            grid = (nr,)
            in_spec = pl.BlockSpec((r_blk, s_total, l_total),
                                   lambda i: (i, 0, 0))
            out_spec = pl.BlockSpec((r_blk, s_total, l_total),
                                    lambda i: (nr - 1 - i, 0, 0))
        else:
            grid = (nr, ns)
            in_spec = pl.BlockSpec((r_blk, s_blk, l_total),
                                   lambda i, s: (i, s, 0))
            out_spec = pl.BlockSpec((r_blk, s_blk, l_total),
                                    lambda i, s: (nr - 1 - i, s, 0))
    else:
        view = (b_total, r_total, s_total, l_total)
        if ns == 1:
            grid = (b_total, nr)
            in_spec = pl.BlockSpec((None, r_blk, s_total, l_total),
                                   lambda b, i: (b, i, 0, 0))
            out_spec = pl.BlockSpec((None, r_blk, s_total, l_total),
                                    lambda b, i: (b, nr - 1 - i, 0, 0))
        else:
            grid = (b_total, nr, ns)
            in_spec = pl.BlockSpec((None, r_blk, s_blk, l_total),
                                   lambda b, i, s: (b, i, s, 0))
            out_spec = pl.BlockSpec((None, r_blk, s_blk, l_total),
                                    lambda b, i, s: (b, nr - 1 - i, s, 0))

    out = pl.pallas_call(
        _flip_planes_kernel,
        out_shape=jax.ShapeDtypeStruct(view, x.dtype),
        grid=grid,
        in_specs=[in_spec],
        out_specs=out_spec,
        compiler_params=pltpu.CompilerParams(
            dimension_semantics=("parallel",) * len(grid),
            vmem_limit_bytes=vmem_limit),
        cost_estimate=pl.CostEstimate(
            flops=0, transcendentals=0, bytes_accessed=2 * nbytes),
    )(x.reshape(view))
    return out.reshape(shape)


def flipping_forward(x: jax.Array, key: jax.Array,
                     probability: float = 1.0, dims=(0, 1)) -> jax.Array:
    """JAX equivalent of Flipping.forward.

    The uniform draw (torch.rand analogue) stays in plain JAX glue; lax.cond
    gates the flip so the copy kernel only runs when the branch is taken.
    (Under vmap / a traced probability, cond degenerates to a select -- still
    correct, just without the skip.)
    """
    u = jax.random.uniform(key, ())            # uniform in [0, 1)
    return lax.cond(probability > u,
                    lambda t: flip_pallas(t, dims),
                    lambda t: t,
                    x)


if __name__ == "__main__":
    key = jax.random.PRNGKey(0)
    kx, kp = jax.random.split(key)

    # Small NCHW shape consistent with the module.
    x = jax.random.normal(kx, (2, 4, 16, 16), dtype=jnp.float32)

    # Force the Pallas kernel on the small tensor (bypass the XLA bailout).
    y = jax.block_until_ready(flip_pallas(x, (0, 1), min_pallas_bytes=0))
    assert y.shape == x.shape and y.dtype == x.dtype
    assert jnp.array_equal(y, jnp.flip(x, axis=(0, 1))), "dims=(0,1) mismatch"

    # Single-axis paths through the same kernel (B==1 and B>1 views).
    assert jnp.array_equal(flip_pallas(x, (0,), min_pallas_bytes=0),
                           jnp.flip(x, axis=0))
    assert jnp.array_equal(flip_pallas(x, (1,), min_pallas_bytes=0),
                           jnp.flip(x, axis=1))

    # Lane-dense medium shape: exercises block-level + static in-block reversal.
    x2 = jax.random.normal(kx, (4, 6, 32, 128), dtype=jnp.float32)
    assert jnp.array_equal(flip_pallas(x2, (0, 1), min_pallas_bytes=0),
                           jnp.flip(x2, axis=(0, 1)))

    # Larger flip extent: exercises the fori_loop (symmetric swap) path.
    x3 = jax.random.normal(kx, (8, 16, 8, 128), dtype=jnp.float32)
    assert jnp.array_equal(flip_pallas(x3, (0, 1), min_pallas_bytes=0),
                           jnp.flip(x3, axis=(0, 1)))

    # Oversized plane: exercises the S-split (bounded-block) path.
    x4 = jax.random.normal(kx, (2, 2, 512, 512), dtype=jnp.float32)
    assert jnp.array_equal(
        flip_pallas(x4, (0, 1), target_block_bytes=256 * 1024),
        jnp.flip(x4, axis=(0, 1)))

    # Full module semantics (probability gate).  probability=1.0 always flips.
    fwd = jax.jit(lambda t, k: flipping_forward(t, k, probability=1.0, dims=(0, 1)))
    out = jax.block_until_ready(fwd(x, kp))
    assert jnp.array_equal(out, jnp.flip(x, axis=(0, 1)))

    # probability=0.0 never flips.
    out0 = jax.block_until_ready(jax.jit(
        lambda t, k: flipping_forward(t, k, probability=0.0, dims=(0, 1)))(x, kp))
    assert jnp.array_equal(out0, x)

    print("KERNEL_OK")
</pallas_src>

<mosaic_0001>
module attributes {stable_mosaic.version = 11 : i64} {
  func.func @_flip_planes_kernel(%arg0: i32, %arg1: memref<4x2x128xf32, #tpu.memory_space<vmem>>, %arg2: memref<4x2x128xf32, #tpu.memory_space<vmem>>) attributes {dimension_semantics = [#tpu.dimension_semantics<parallel>], iteration_bounds = array<i64: 2>, scalar_prefetch = 0 : i64, scratch_operands = 0 : i64, tpu.core_type = #tpu.core_type<tc>, window_params = [{transform_indices = @transform_0, window_bounds = array<i64: 4, 2, 128>}, {transform_indices = @transform_1, window_bounds = array<i64: 4, 2, 128>}]} {
    %c0 = arith.constant 0 : index
    %c0_0 = arith.constant 0 : index
    %c0_1 = arith.constant 0 : index
    %0 = vector.load %arg1[%c0, %c0_0, %c0_1] : memref<4x2x128xf32, #tpu.memory_space<vmem>>, vector<1x2x128xf32>
    %c3 = arith.constant 3 : index
    %c0_2 = arith.constant 0 : index
    %c0_3 = arith.constant 0 : index
    %1 = vector.load %arg2[%c3, %c0_2, %c0_3] : memref<4x2x128xf32, #tpu.memory_space<vmem>>, vector<1x2x128xf32>
    tpu.vector_store %arg2[%c3, %c0_2, %c0_3], %0 {strides = array<i32>} : memref<4x2x128xf32, #tpu.memory_space<vmem>>, vector<1x2x128xf32>,
    %c1 = arith.constant 1 : index
    %c0_4 = arith.constant 0 : index
    %c0_5 = arith.constant 0 : index
    %2 = vector.load %arg1[%c1, %c0_4, %c0_5] : memref<4x2x128xf32, #tpu.memory_space<vmem>>, vector<1x2x128xf32>
    %c2 = arith.constant 2 : index
    %c0_6 = arith.constant 0 : index
    %c0_7 = arith.constant 0 : index
    %3 = vector.load %arg2[%c2, %c0_6, %c0_7] : memref<4x2x128xf32, #tpu.memory_space<vmem>>, vector<1x2x128xf32>
    tpu.vector_store %arg2[%c2, %c0_6, %c0_7], %2 {strides = array<i32>} : memref<4x2x128xf32, #tpu.memory_space<vmem>>, vector<1x2x128xf32>,
    %c2_8 = arith.constant 2 : index
    %c0_9 = arith.constant 0 : index
    %c0_10 = arith.constant 0 : index
    %4 = vector.load %arg1[%c2_8, %c0_9, %c0_10] : memref<4x2x128xf32, #tpu.memory_space<vmem>>, vector<1x2x128xf32>
    %c1_11 = arith.constant 1 : index
    %c0_12 = arith.constant 0 : index
    %c0_13 = arith.constant 0 : index
    %5 = vector.load %arg2[%c1_11, %c0_12, %c0_13] : memref<4x2x128xf32, #tpu.memory_space<vmem>>, vector<1x2x128xf32>
    tpu.vector_store %arg2[%c1_11, %c0_12, %c0_13], %4 {strides = array<i32>} : memref<4x2x128xf32, #tpu.memory_space<vmem>>, vector<1x2x128xf32>,
    %c3_14 = arith.constant 3 : index
    %c0_15 = arith.constant 0 : index
    %c0_16 = arith.constant 0 : index
    %6 = vector.load %arg1[%c3_14, %c0_15, %c0_16] : memref<4x2x128xf32, #tpu.memory_space<vmem>>, vector<1x2x128xf32>
    %c0_17 = arith.constant 0 : index
    %c0_18 = arith.constant 0 : index
    %c0_19 = arith.constant 0 : index
    %7 = vector.load %arg2[%c0_17, %c0_18, %c0_19] : memref<4x2x128xf32, #tpu.memory_space<vmem>>, vector<1x2x128xf32>
    tpu.vector_store %arg2[%c0_17, %c0_18, %c0_19], %6 {strides = array<i32>} : memref<4x2x128xf32, #tpu.memory_space<vmem>>, vector<1x2x128xf32>,
    return
  }
  func.func @transform_0(%arg0: i32) -> (i32, i32, i32) {
    %c0_i32 = arith.constant 0 : i32
    %c0_i32_0 = arith.constant 0 : i32
    %c0_i32_1 = arith.constant 0 : i32
    return %arg0, %c0_i32, %c0_i32_0 : i32, i32, i32
  }
  func.func @transform_1(%arg0: i32) -> (i32, i32, i32) {
    %c1_i32 = arith.constant 1 : i32
    %0 = arith.subi %c1_i32, %arg0 : i32
    %c0_i32 = arith.constant 0 : i32
    %c0_i32_0 = arith.constant 0 : i32
    %c0_i32_1 = arith.constant 0 : i32
    return %0, %c0_i32, %c0_i32_0 : i32, i32, i32
  }
}

</mosaic_0001>

<bundles_post_ra>
// kernel: tpu_custom_call.1
= control target key start
LH: loop header
LB: loop body
LE: loop exit
PB: predicated region body
PF: predicated region fallthrough
CT: control target
= control target key end

     0   :  { %6 = vsyncpa [#allocation3], 0  ;;  %s633_s0 = inlined_call_operand.hbm [shape: f32[8,2,128], index: 0, kind: input, shape index: {}]   ;;  %s634_s1 = inlined_call_operand.hbm [shape: f32[8,2,128], index: 1, kind: output, shape index: {}]  }
   0x1   :  { %8 = vsyncpa [#allocation3 + $0x1], 0 }
   0x2   :  { %9 = vsyncpa [#allocation4], 0 }
   0x3   :  { %11 = vsyncpa [#allocation4 + $0x1], 0  ;;  %s478_s6 = smov 0   ;;  %s480_s7 = smov 0  }
   0x4   :  { %s482_s8 = smov 0   ;;  %s484_s9 = smov 0  }
   0x5   :  { %s486_s10 = smov 0   ;;  %s488_s11 = smov 0  }
   0x6   :  { %s490_s12 = smov 0  }
   0x7 LB: > { %s512_s13 = sadd.s32 4294967295, %s462_s12   ;;  %s246_s14 = sadd.s32 4294967294, %s462_s12   ;;  %s462_s12 = sphi %s490_s12, %s646_s12   ;;  %s458_s11 = sphi %s488_s11, %s645_s11   ;;  %s454_s10 = sphi %s486_s10, %s644_s10   ;;  %s450_s9 = sphi %s484_s9, %s643_s9   ;;  %s446_s8 = sphi %s482_s8, %s642_s8   ;;  %s442_s7 = sphi %s480_s7, %s641_s7   ;;  %s438_s6 = sphi %s478_s6, %s640_s6  }
   0x8   : > { %s516_s15 = sadd.s32 1, %s462_s12   ;;  %s24_s16 = sadd.s32 1, %s458_s11 }
   0x9   : > { %s21_s17 = ssub.s32 %s462_s12, %s516_s15  ;;  %p31_p0 = scmp.ne.s32.totalorder %s458_s11, %s454_s10 }
   0xa   : > { %p22_p1 = scmp.eq.s32.totalorder %s21_s17, 0  ;;  %p32_p2 = scmp.eq.s32.totalorder %s462_s12, 0 }
   0xb   : > { %p37_p3 = scmp.ne.s32.totalorder %s454_s10, %s450_s9  ;;  %p38_p4 = scmp.eq.s32.totalorder %s512_s13, 0 }
   0xc   : > { %s527_s18 = scalar_select %p22_p1, %s458_s11, %s24_s16  }
   0xd   : > { %p529_p5 = por %p32_p2, %p31_p0  ;;  %p533_p6 = por %p38_p4, %p37_p3 }
   0xe   : > { %s47_s21 = ssub.s32 1, %s462_s12  ;;  %s48_s22 = ssub.s32 1, %s516_s15 }
   0xf   : > { %s49_s23 = ssub.s32 %s47_s21, %s48_s22  ;;  %s52_s24 = sadd.s32 1, %s446_s8 }
  0x10   : > { %p50_p7 = scmp.eq.s32.totalorder %s49_s23, 0  ;;  %p62_p8 = scmp.ne.s32.totalorder %s446_s8, %s442_s7 }
  0x11   : > { %p63_p9 = scmp.eq.s32.totalorder %s512_s13, 1  ;;  %p68_p10 = scmp.ne.s32.totalorder %s442_s7, %s438_s6 }
  0x12   : > { %s546_s25 = scalar_select %p50_p7, %s446_s8, %s52_s24  }
  0x13   : > { %p548_p11 = por %p63_p9, %p62_p8  ;;  %p69_p12 = scmp.eq.s32.totalorder %s246_s14, 1 }
  0x14   : > { %p248_p13 = scmp.ge.s32.totalorder %s462_s12, 2  ;;  %p280_p0 = scmp.lt.s32.totalorder %s462_s12, 2 }
  0x15   : > { %p554_p1 = por %p69_p12, %p68_p10  ;;  %s89_s28 = sand.u32 1, %s458_s11  }
  0x16   : > { %s249_s29 = sshll.u32 %s89_s28, 3  ;;  %s266_s30 = sshll.u32 %s462_s12, 3 }
  0x17   : > { %s98_s4 = scalar_lea.hbm %s633_s0, %s266_s30  ;;  %s93_s5 = scalar_lea.vmem [#allocation2], %s249_s29 }
  0x18   : > { %s101_s9 = sshll.u32 %s93_s5, 4  ;;  %s99_s16 = sshll.u32 %s98_s4, 4  ;;  %s102_s9 = int_to_ptr.vmem [resolvable:$true] %s101_s9  ;;  %s100_s16 = int_to_ptr.hbm [resolvable:$true] %s99_s16 }
  0x19   : > { %p565_p2 = pnand %p280_p0, %p529_p5  ;;  %p252_p3 = scmp.ge.s32.totalorder %s462_s12, 1 }
  0x1a   : > { %s90_s17 = scalar_lea.sflag [#allocation3], %s89_s28  ;;  %s342_s21 = sshra.s32 %s100_s16, 4  ;;  %s343_s21 = int_to_ptr.hbm [resolvable:$true] %s342_s21 }
  0x1b   : > { %s344_s22 = scalar_lea.hbm %s343_s21, 8  ;;  %p346_p7 = pneg %p565_p2 }
  0x1c   : > { %p345_p4 = scmp.ne.s32.totalorder %s343_s21, %s344_s22  ;;  %s349_s29 = scalar_lea.hbm %s633_s0, 16 }
  0x1d   : > { %p350_p5 = scmp.lt.s32.totalorder %s343_s21, %s633_s0  ;;  %p351_p10 = scmp.lt.s32.totalorder %s349_s29, %s344_s22 }
  0x1e   : > { %p347_p8 = pnand %p346_p7, %p345_p4 }
  0x1f   : > { %p352_p12 = por %p351_p10, %p350_p5 }
  0x20   : > { %p348_p9 = pneg %p347_p8 }
  0x22   : > { %p353_p0 = pnand %p352_p12, %p348_p9 }
  0x24   : > { %356 = shalt.err (!%p353_p0)
}
  0x25   : > { %s464_s28 = smov 32   ;;  %s465_s2 = smov 2  }
  0x26   : > { %275 = dma.hbm_to_vmem [thread:$0]  (!%p565_p2), %s100_s16, 128, %s102_s9, %s90_s17, %s464_s28, %s464_s28, %s465_s2  }
  0x27   : > { %p109_p4 = scmp.lt.s32.totalorder %s462_s12, 3 }
  0x29   : > { %p110_p7 = pnand %p252_p3, %p109_p4 }
  0x2a   : > { %s115_s3 = sand.u32 (!%p110_p7), 1, %s454_s10  }
  0x2b   : > { %113 = sbr.rel (%p110_p7) target bundleno = 66 (0x42), region = 24  ;;  %s253_s4 = sshll.u32 (!%p110_p7), %s115_s3, 3 }
  0x2c   : > { %s116_s5 = scalar_lea.sflag (!%p110_p7), [#allocation3], %s115_s3  ;;  %s119_s21 = scalar_lea.vmem (!%p110_p7), [#allocation2], %s253_s4 }
  0x30   : > { %429 = dma.done.wait (%p533_p6), %s116_s5, 128  }
  0x31   : > { %431 = vsyncadd (%p533_p6), %s116_s5, 4294967168  ;;  %s136_s22 = sand.u32 1, %s442_s7   ;;  %s164_s14 = ssub.s32 1, %s512_s13  ;;  %v142_v0 = vld [vmem:[%s119_s21] sm:$0x3] }
  0x32   : > { %s254_s9 = sshll.u32 %s136_s22, 3  ;;  %s267_s16 = sshll.u32 %s164_s14, 3  ;;  %v256_v1 = vld [vmem:[%s119_s21 + $0x2] sm:$0x3]  ;;  %v258_v2 = vld [vmem:[%s119_s21 + $0x4] sm:$0x3] }
  0x33   : > { %s169_s24 = scalar_lea.hbm %s634_s1, %s267_s16  ;;  %s138_s29 = scalar_lea.vmem [#allocation5], %s254_s9  ;;  %v260_v3 = vld [vmem:[%s119_s21 + $0x6] sm:$0x3] }
  0x34   : > { %s170_s19 = sshll.u32 %s138_s29, 4  ;;  %s593_s30 = sshll.u32 %s169_s24, 4  ;;  %255 = vst [vmem:[%s138_s29 + $0x6] sm:$0x3] %v142_v0  ;;  %s171_s19 = int_to_ptr.vmem [resolvable:$true] %s170_s19  ;;  %s173_s30 = int_to_ptr.hbm [resolvable:$true] %s593_s30 }
  0x35   : > { %257 = vst [vmem:[%s138_s29 + $0x4] sm:$0x3] %v256_v1  ;;  %s157_s13 = scalar_lea.sflag [#allocation4], %s136_s22  ;;  %s386_s20 = sshra.s32 %s173_s30, 4  ;;  %s387_s20 = int_to_ptr.hbm [resolvable:$true] %s386_s20 }
  0x36   : > { %259 = vst [vmem:[%s138_s29 + $0x2] sm:$0x3] %v258_v2  ;;  %s388_s28 = scalar_lea.hbm %s387_s20, 8  ;;  %s392_s4 = scalar_lea.hbm %s634_s1, 16 }
  0x37   : > { %155 = vst [vmem:[%s138_s29] sm:$0x3] %v260_v3  ;;  %p389_p6 = scmp.ne.s32.totalorder %s387_s20, %s388_s28  ;;  %p393_p8 = scmp.lt.s32.totalorder %s387_s20, %s634_s1 }
  0x38   : > { %p394_p9 = scmp.lt.s32.totalorder %s392_s4, %s388_s28 }
  0x39   : > { %p390_p2 = pnand %p389_p6, %p548_p11 }
  0x3a   : > { %p395_p5 = por %p394_p9, %p393_p8 }
  0x3b   : > { %p391_p3 = pneg %p390_p2 }
  0x3d   : > { %p396_p10 = pnand %p395_p5, %p391_p3 }
  0x3f   : > { %399 = shalt.err (!%p396_p10)
}
  0x40   : > { %s466_s21 = smov 32   ;;  %s467_s22 = smov 2  }
  0x41   : > { %270 = dma.vmem_to_hbm [thread:$0]  (%p548_p11), %s171_s19, 128, %s173_s30, %s157_s13, %s466_s21, %s466_s21, %s467_s22  }
  0x42 PF: > { %s187_s9 = sand.u32 1, %s438_s6   ;;  %p277_p12 = pnand %p248_p13, %p554_p1 }
  0x43   : > { %s188_s16 = scalar_lea.sflag [#allocation4], %s187_s9 }
  0x44   : > { %p278_p0 = pneg %p277_p12 }
  0x46   : > { %433 = dma.done.wait (%p278_p0), %s188_s16, 128  }
  0x47   : > { %435 = vsyncadd (%p278_p0), %s188_s16, 4294967168  ;;  %p14_p11 = scmp.ge.s32.totalorder %s516_s15, 4   ;;  %s640_s6 = smov %s442_s7 }
  0x48   : > { %s641_s7 = smov %s446_s8  ;;  %s642_s8 = smov %s546_s25 }
  0x49   : > { %s643_s9 = smov %s454_s10  ;;  %s644_s10 = smov %s458_s11 }
  0x4a   : > { %s645_s11 = smov %s527_s18  ;;  %s646_s12 = smov %s516_s15 }
  0x4b   :  { %16 = sbr.rel (!%p14_p11) target bundleno = 7 (0x7), region = 75 }
  0x50   :  { %194 = vsyncpa [#allocation3], 1 }
  0x51   :  { %196 = vsyncpa [#allocation3 + $0x1], 1 }
  0x52   :  { %197 = vsyncpa [#allocation4], 1 }
  0x53   :  { %199 = vsyncpa [#allocation4 + $0x1], 1 }

</bundles_post_ra>
